<compile_context>
chip_gen: v7x
topology: tpu7x:2x2x1
jax: 0.10.0
libtpu: 0.0.40
codegen_flags: <defaults>
</compile_context>

<pallas_src>
import jax
import jax.numpy as jnp
from jax.experimental import pallas as pl
from jax.experimental.pallas import tpu as pltpu


_LANES = 1024        # lane-dense slab width (>=512 lanes avoids masked stores)
_TILE_ROWS = 1024    # 1024 rows x 1024 lanes x 4 B = 4 MiB per block


def _copy_kernel(x_ref, o_ref):
    # Pure pass-through: ModuleTemp(None).forward(x) == x
    o_ref[...] = x_ref[...]


def _pallas_copy_flat(flat: jax.Array, *, sublane_mult: int = 8,
                      donate: bool = False) -> jax.Array:
    """Identity-copy a 1-D array through a lane-dense, tiled Pallas kernel."""
    n = flat.shape[0]
    dtype = flat.dtype

    lanes = _LANES
    rows = pl.cdiv(n, lanes)
    padded = rows * lanes
    if padded != n:
        flat = jnp.pad(flat, (0, padded - n))
    x2d = flat.reshape(rows, lanes)

    # Fixed, aligned tile; Pallas handles the partial last block via cdiv grid.
    if rows <= sublane_mult:
        tile_rows = rows                                   # full extent: legal
    else:
        tile_rows = min(_TILE_ROWS, (rows // sublane_mult) * sublane_mult)
    grid = (pl.cdiv(rows, tile_rows),)

    out2d = pl.pallas_call(
        _copy_kernel,
        out_shape=jax.ShapeDtypeStruct((rows, lanes), dtype),
        grid_spec=pltpu.PrefetchScalarGridSpec(
            num_scalar_prefetch=0,
            grid=grid,
            in_specs=[pl.BlockSpec((tile_rows, lanes), lambda i: (i, 0))],
            out_specs=pl.BlockSpec((tile_rows, lanes), lambda i: (i, 0)),
        ),
        compiler_params=pltpu.CompilerParams(
            dimension_semantics=("parallel",),     # shards rows across v7x TCs
            vmem_limit_bytes=32 * 1024 * 1024,     # 4 bufs x 4 MiB << 32 MiB
        ),
        input_output_aliases={0: 0} if donate else {},
    )(x2d)

    out_flat = out2d.reshape(padded)
    if padded != n:
        out_flat = out_flat[:n]
    return out_flat


def module_temp_forward(x: jax.Array, *, donate: bool = False) -> jax.Array:
    """Forward pass of ModuleTemp(module_dict=None): identity pass-through."""
    orig_shape = x.shape
    orig_dtype = x.dtype
    n = x.size
    if n == 0:
        return x

    flat = x.reshape(-1)
    itemsize = jnp.dtype(orig_dtype).itemsize

    if itemsize == 4:
        # f32 / i32 / u32: bit-exact reinterpret as uint32 words.
        words = jax.lax.bitcast_convert_type(flat, jnp.uint32)
        out = jax.lax.bitcast_convert_type(
            _pallas_copy_flat(words, sublane_mult=8, donate=donate),
            orig_dtype)
    elif itemsize < 4 and (n * itemsize) % 4 == 0:
        # bf16/f16/i16/i8/u8/fp8: pack into 32-bit words so f32 tiling applies.
        k = 4 // itemsize
        words = jax.lax.bitcast_convert_type(flat.reshape(-1, k), jnp.uint32)
        out = jax.lax.bitcast_convert_type(
            _pallas_copy_flat(words, sublane_mult=8, donate=donate),
            orig_dtype).reshape(-1)
    else:
        # Rare path (odd-length sub-32-bit buffers, 64-bit dtypes, bool):
        # copy in the native dtype with a 32-row sublane multiple, which is
        # legal for every packed dtype (f32:8, bf16:16, int8/fp8:32).
        out = _pallas_copy_flat(flat, sublane_mult=32, donate=donate)

    return out.reshape(orig_shape)


# NOTE: ModuleTemp with a non-None module_dict wraps user-supplied submodules
# in an nn.Sequential; the class itself defines no concrete submodules, so the
# default (identity) path is the only fully-defined forward.
# TODO(synk): load_weights / save_weights / print_summary / trans_para /
# check_para are torch I/O & summary utilities with no Pallas equivalent.


if __name__ == "__main__":
    key = jax.random.PRNGKey(0)
    # Small NCHW input consistent with a conv-style model: B=2, C=4, H=W=16.
    x = jax.random.normal(key, (2, 4, 16, 16), dtype=jnp.float32)

    y = module_temp_forward(x)
    y = jax.block_until_ready(y)

    # Verify exact identity semantics of ModuleTemp(None).forward
    assert y.shape == x.shape
    assert y.dtype == x.dtype
    assert bool(jnp.all(y == x))

    print("KERNEL_OK")
</pallas_src>

<mosaic_0001>
module attributes {stable_mosaic.version = 11 : i64} {
  func.func @_copy_kernel(%arg0: i32, %arg1: memref<2x1024xi32, #tpu.memory_space<vmem>>, %arg2: memref<2x1024xi32, #tpu.memory_space<vmem>>) attributes {dimension_semantics = [#tpu.dimension_semantics<parallel>], iteration_bounds = array<i64: 1>, scalar_prefetch = 0 : i64, scratch_operands = 0 : i64, tpu.core_type = #tpu.core_type<tc>, window_params = [{transform_indices = @transform_0, window_bounds = array<i64: 2, 1024>}, {transform_indices = @transform_1, window_bounds = array<i64: 2, 1024>}]} {
    %c0 = arith.constant 0 : index
    %c0_0 = arith.constant 0 : index
    %0 = vector.load %arg1[%c0, %c0_0] : memref<2x1024xi32, #tpu.memory_space<vmem>>, vector<2x1024xi32>
    %c0_1 = arith.constant 0 : index
    %c0_2 = arith.constant 0 : index
    %1 = vector.load %arg2[%c0_1, %c0_2] : memref<2x1024xi32, #tpu.memory_space<vmem>>, vector<2x1024xi32>
    tpu.vector_store %arg2[%c0_1, %c0_2], %0 {strides = array<i32>} : memref<2x1024xi32, #tpu.memory_space<vmem>>, vector<2x1024xi32>,
    return
  }
  func.func @transform_0(%arg0: i32) -> (i32, i32) {
    %c0_i32 = arith.constant 0 : i32
    %c0_i32_0 = arith.constant 0 : i32
    return %arg0, %c0_i32 : i32, i32
  }
  func.func @transform_1(%arg0: i32) -> (i32, i32) {
    %c0_i32 = arith.constant 0 : i32
    %c0_i32_0 = arith.constant 0 : i32
    return %arg0, %c0_i32 : i32, i32
  }
}

</mosaic_0001>

<bundles_post_ra>
// kernel: tpu_custom_call.1
= control target key start
LH: loop header
LB: loop body
LE: loop exit
PB: predicated region body
PF: predicated region fallthrough
CT: control target
= control target key end

     0   :  { %6 = vsyncpa [#allocation3], 0  ;;  %s126_s0 = inlined_call_operand.hbm [shape: u32[2,1024], index: 0, kind: input, shape index: {}]   ;;  %s127_s1 = inlined_call_operand.hbm [shape: u32[2,1024], index: 1, kind: output, shape index: {}]  }
   0x1   :  { %7 = vsyncpa [#allocation4], 0  ;;  %s90_s6 = smov [#allocation2]   ;;  %s42_s10 = scalar_lea.hbm %s126_s0, 256 }
   0x2   :  { %s14_s7 = sshll.u32 %s90_s6, 4  ;;  %p43_p0 = scmp.ne.s32.totalorder %s126_s0, %s42_s10  ;;  %s15_s7 = int_to_ptr.vmem [resolvable:$true] %s14_s7 }
   0x3   :  { %p46_p1 = scmp.lt.u32.totalorder %s42_s10, %s126_s0 }
   0x5   :  { %p48_p2 = pnand %p46_p1, %p43_p0 }
   0x7   :  { %51 = shalt.err (!%p48_p2)
}
   0x8   :  { %s52_s15 = scalar_lea.vmem %s15_s7, 256  ;;  %p57_p4 = scmp.lt.s32.totalorder %s15_s7, %s15_s7 }
   0x9   :  { %p53_p3 = scmp.ne.s32.totalorder %s15_s7, %s52_s15  ;;  %p58_p5 = scmp.lt.s32.totalorder %s52_s15, %s52_s15 }
   0xb   :  { %p59_p6 = por %p58_p5, %p57_p4 }
   0xd   :  { %p60_p7 = pnand %p59_p6, %p53_p3 }
   0xf   :  { %63 = shalt.err (!%p60_p7)
}
  0x10   :  { %17 = dma.hbm_to_vmem [thread:$0]  %s126_s0, 256, %s15_s7, [#allocation3]  }
  0x11   :  { %86 = dma.done.wait [#allocation3], 256  }
  0x12   :  { %87 = vsyncadd [#allocation3], 4294967040  ;;  %s91_s18 = smov [#allocation5]   ;;  %v21_v0 = vld [vmem:[#allocation2] sm:$0xff]  ;;  %v22_v1 = vld [vmem:[#allocation2 + $0x8] sm:$0xff] }
  0x13   :  { %s31_s19 = sshll.u32 %s91_s18, 4  ;;  %23 = vst [vmem:[#allocation5] sm:$0xff] %v21_v0  ;;  %24 = vst [vmem:[#allocation5 + $0x8] sm:$0xff] %v22_v1  ;;  %s32_s19 = int_to_ptr.vmem [resolvable:$true] %s31_s19 }
  0x14   :  { %s64_s20 = scalar_lea.vmem %s32_s19, 256  ;;  %p69_p9 = scmp.lt.s32.totalorder %s32_s19, %s32_s19 }
  0x15   :  { %p65_p8 = scmp.ne.s32.totalorder %s32_s19, %s64_s20  ;;  %p70_p10 = scmp.lt.s32.totalorder %s64_s20, %s64_s20 }
  0x17   :  { %p71_p11 = por %p70_p10, %p69_p9 }
  0x19   :  { %p72_p12 = pnand %p71_p11, %p65_p8 }
  0x1b   :  { %75 = shalt.err (!%p72_p12)
}
  0x1c   :  { %s76_s0 = scalar_lea.hbm %s127_s1, 256 }
  0x1d   :  { %p77_p13 = scmp.ne.s32.totalorder %s127_s1, %s76_s0  ;;  %p80_p0 = scmp.lt.u32.totalorder %s76_s0, %s127_s1 }
  0x1f   :  { %p82_p1 = pnand %p80_p0, %p77_p13 }
  0x21   :  { %85 = shalt.err (!%p82_p1)
}
  0x22   :  { %34 = dma.vmem_to_hbm [thread:$0]  %s32_s19, 256, %s127_s1, [#allocation4]  }
  0x23   :  { %88 = dma.done.wait [#allocation4], 256  }
  0x24   :  { %89 = vsyncadd [#allocation4], 4294967040 }
  0x25   :  { %38 = vsyncpa [#allocation3], 1 }
  0x26   :  { %39 = vsyncpa [#allocation4], 1 }

</bundles_post_ra>
